<compile_context>
chip_gen: v6e
topology: v6e:2x2x1
jax: 0.10.0
libtpu: 0.0.40
codegen_flags: <defaults>
</compile_context>

<pallas_src>
import jax
import jax.numpy as jnp
from jax.experimental import pallas as pl
from jax.experimental.pallas import tpu as pltpu

N_FEATS = 16    # feats
N_HIDDEN = 32   # config['num_hidden']
N_LATENT = 8    # config['latent']

TB = 8          # batch tile (sublane multiple)

# Row offsets of each (in_dim, out_dim) weight inside the packed weight slab.
_W_ROWS = {
    "wih0": (0, 16),     # (F, 3H)
    "wih1": (16, 48),    # (H, 3H)
    "e1w":  (48, 80),    # (H, H)
    "e2w":  (80, 112),   # (H, H)
    "e3w":  (112, 144),  # (H, 2L)
    "d1w":  (144, 152),  # (L, H)
    "d2w":  (152, 184),  # (H, H)
    "d3w":  (184, 216),  # (H, F)
}
_W_SLAB_ROWS = 216
_B_SLAB_ROWS = 16        # rows 0..9 used


def omni_kernel(xin_ref, w_ref, b_ref, a_ref, out_ref):
    """xin_ref:(TB,128)  w_ref:(216,128)  b_ref:(16,128)  a_ref:(4,) SMEM."""
    F, H, L = N_FEATS, N_HIDDEN, N_LATENT
    B = xin_ref.shape[0]

    x = xin_ref[:, 0:F]              # (B, F)
    eps = xin_ref[:, F:F + L]        # (B, L)

    # ---- biases (one row each, broadcast over the batch) ----
    bih0 = b_ref[0:1, 0:3 * H]
    bhh0 = b_ref[1:2, 0:3 * H]
    bih1 = b_ref[2:3, 0:3 * H]
    bhh1 = b_ref[3:4, 0:3 * H]
    e1b = b_ref[4:5, 0:H]
    e2b = b_ref[5:6, 0:H]
    e3b = b_ref[6:7, 0:2 * L]
    d1b = b_ref[7:8, 0:H]
    d2b = b_ref[8:9, 0:H]
    d3b = b_ref[9:10, 0:F]

    # ---- PReLU scalars from SMEM ----
    a1 = a_ref[0]
    a2 = a_ref[1]
    a3 = a_ref[2]
    a4 = a_ref[3]

    # ---- weights (pre-transposed, sliced out of the packed slab) ----
    wih0 = w_ref[_W_ROWS["wih0"][0]:_W_ROWS["wih0"][1], 0:3 * H]
    wih1 = w_ref[_W_ROWS["wih1"][0]:_W_ROWS["wih1"][1], 0:3 * H]
    e1w = w_ref[_W_ROWS["e1w"][0]:_W_ROWS["e1w"][1], 0:H]
    e2w = w_ref[_W_ROWS["e2w"][0]:_W_ROWS["e2w"][1], 0:H]
    e3w = w_ref[_W_ROWS["e3w"][0]:_W_ROWS["e3w"][1], 0:2 * L]
    d1w = w_ref[_W_ROWS["d1w"][0]:_W_ROWS["d1w"][1], 0:H]
    d2w = w_ref[_W_ROWS["d2w"][0]:_W_ROWS["d2w"][1], 0:H]
    d3w = w_ref[_W_ROWS["d3w"][0]:_W_ROWS["d3w"][1], 0:F]

    def gru_cell_zero_h(xv, wih_t, bih, bhh):
        # h_prev == 0  =>  gh = bhh  and the z*h_prev term vanishes.
        gi = jnp.dot(xv, wih_t, preferred_element_type=jnp.float32) + bih  # (B,3H)
        r = jax.nn.sigmoid(gi[:, 0:H] + bhh[:, 0:H])
        z = jax.nn.sigmoid(gi[:, H:2 * H] + bhh[:, H:2 * H])
        n = jnp.tanh(gi[:, 2 * H:3 * H] + r * bhh[:, 2 * H:3 * H])
        return (1.0 - z) * n

    def prelu(v, a):
        return jnp.where(v >= 0.0, v, a * v)

    # --- 2-layer GRU, single time step, hidden=None (zeros) ---
    h1 = gru_cell_zero_h(x, wih0, bih0, bhh0)    # (B, H)
    h2 = gru_cell_zero_h(h1, wih1, bih1, bhh1)   # (B, H) = GRU output

    # --- encoder ---
    e1 = prelu(jnp.dot(h2, e1w, preferred_element_type=jnp.float32) + e1b, a1)
    e2 = prelu(jnp.dot(e1, e2w, preferred_element_type=jnp.float32) + e2b, a2)
    enc = jnp.dot(e2, e3w, preferred_element_type=jnp.float32) + e3b     # (B, 2L)

    mu = enc[:, 0:L]
    logvar = enc[:, L:2 * L]
    zs = mu + eps * jnp.exp(0.5 * logvar)

    # --- decoder ---
    d1 = prelu(jnp.dot(zs, d1w, preferred_element_type=jnp.float32) + d1b, a3)
    d2 = prelu(jnp.dot(d1, d2w, preferred_element_type=jnp.float32) + d2b, a4)
    rec = jax.nn.sigmoid(jnp.dot(d2, d3w, preferred_element_type=jnp.float32) + d3b)

    # --- single lane-dense output slab: recon | mu | logvar | h1 | h2 | pad ---
    pad = jnp.zeros((B, 128 - (F + 2 * L + 2 * H)), jnp.float32)   # 32 lanes
    out_ref[...] = jnp.concatenate([rec, mu, logvar, h1, h2, pad], axis=-1)


def omni_anomaly_forward(x, eps, wslab, bslab, prelu_a):
    """Batched forward: each row of x is one independent hidden=None call.

    x: (B, F) float32, eps: (B, L) float32.
    Returns recon (B,F), mu (B,L), logvar (B,L), hidden (B,2,1,H).
    """
    B = x.shape[0]
    assert B % TB == 0, "batch must be a multiple of the tile size"
    F, H, L = N_FEATS, N_HIDDEN, N_LATENT

    # one lane-dense input slab: x | eps | pad
    xin = jnp.zeros((B, 128), jnp.float32)
    xin = xin.at[:, 0:F].set(x.astype(jnp.float32))
    xin = xin.at[:, F:F + L].set(eps.astype(jnp.float32))

    out = pl.pallas_call(
        omni_kernel,
        out_shape=jax.ShapeDtypeStruct((B, 128), jnp.float32),
        grid=(B // TB,),
        in_specs=[
            pl.BlockSpec((TB, 128), lambda i: (i, 0)),                 # activations
            pl.BlockSpec((_W_SLAB_ROWS, 128), lambda i: (0, 0)),       # weights (pinned)
            pl.BlockSpec((_B_SLAB_ROWS, 128), lambda i: (0, 0)),       # biases  (pinned)
            pl.BlockSpec(memory_space=pltpu.MemorySpace.SMEM),         # PReLU scalars
        ],
        out_specs=pl.BlockSpec((TB, 128), lambda i: (i, 0)),
        compiler_params=pltpu.CompilerParams(
            dimension_semantics=("parallel",)),
    )(xin, wslab, bslab, prelu_a)

    rec = out[:, 0:F]
    mu = out[:, F:F + L]
    lv = out[:, F + L:F + 2 * L]
    h1 = out[:, F + 2 * L:F + 2 * L + H]
    h2 = out[:, F + 2 * L + H:F + 2 * L + 2 * H]
    hidden = jnp.stack([h1, h2], axis=1)[:, :, None, :]                # (B,2,1,H)
    return rec, mu, lv, hidden


def init_params(key):
    """Synthetic init mirroring the nn.Module parameter shapes, then packed."""
    H, F, L = N_HIDDEN, N_FEATS, N_LATENT
    keys = iter(jax.random.split(key, 32))

    def u(shape, fan):
        bound = 1.0 / (fan ** 0.5)
        return jax.random.uniform(next(keys), shape, jnp.float32, -bound, bound)

    p = {
        # GRU layer 0 (dense weights generated already transposed: (in, out))
        "wih0": u((F, 3 * H), H), "whh0": u((H, 3 * H), H),
        "bih0": u((3 * H,), H), "bhh0": u((3 * H,), H),
        # GRU layer 1
        "wih1": u((H, 3 * H), H), "whh1": u((H, 3 * H), H),
        "bih1": u((3 * H,), H), "bhh1": u((3 * H,), H),
        # encoder
        "e1w": u((H, H), H), "e1b": u((H,), H),
        "e2w": u((H, H), H), "e2b": u((H,), H),
        "e3w": u((H, 2 * L), H), "e3b": u((2 * L,), H),
        # decoder
        "d1w": u((L, H), L), "d1b": u((H,), L),
        "d2w": u((H, H), H), "d2b": u((H,), H),
        "d3w": u((H, F), H), "d3b": u((F,), H),
    }
    prelu_a = jnp.full((4,), 0.25, jnp.float32)  # PyTorch PReLU default

    # ---- pack live weights into one lane-dense slab (W_hh is dead: h0==0) ----
    wslab = jnp.zeros((_W_SLAB_ROWS, 128), jnp.float32)
    for name, (r0, r1) in _W_ROWS.items():
        w = p[name]
        wslab = wslab.at[r0:r0 + w.shape[0], 0:w.shape[1]].set(w)

    # ---- pack biases into one slab (one row per bias) ----
    bslab = jnp.zeros((_B_SLAB_ROWS, 128), jnp.float32)
    for row, name in enumerate(["bih0", "bhh0", "bih1", "bhh1",
                                "e1b", "e2b", "e3b", "d1b", "d2b", "d3b"]):
        b = p[name]
        bslab = bslab.at[row, 0:b.shape[0]].set(b)

    return wslab, bslab, prelu_a, p


def _reference_forward(x, eps, p):
    """Pure-jnp reference with the full PyTorch math (incl. the W_hh terms)."""
    H, L = N_HIDDEN, N_LATENT

    def gru(xv, h, wih_t, whh_t, bih, bhh):
        gi = xv @ wih_t + bih
        gh = h @ whh_t + bhh
        r = jax.nn.sigmoid(gi[:, :H] + gh[:, :H])
        z = jax.nn.sigmoid(gi[:, H:2 * H] + gh[:, H:2 * H])
        n = jnp.tanh(gi[:, 2 * H:] + r * gh[:, 2 * H:])
        return (1.0 - z) * n + z * h

    pr = lambda v, a: jnp.where(v >= 0.0, v, a * v)
    h0 = jnp.zeros((x.shape[0], H), jnp.float32)
    h1 = gru(x, h0, p["wih0"], p["whh0"], p["bih0"], p["bhh0"])
    h2 = gru(h1, h0, p["wih1"], p["whh1"], p["bih1"], p["bhh1"])
    e1 = pr(h2 @ p["e1w"] + p["e1b"], 0.25)
    e2 = pr(e1 @ p["e2w"] + p["e2b"], 0.25)
    enc = e2 @ p["e3w"] + p["e3b"]
    mu, lv = enc[:, :L], enc[:, L:]
    zs = mu + eps * jnp.exp(0.5 * lv)
    d1 = pr(zs @ p["d1w"] + p["d1b"], 0.25)
    d2 = pr(d1 @ p["d2w"] + p["d2b"], 0.25)
    rec = jax.nn.sigmoid(d2 @ p["d3w"] + p["d3b"])
    return rec, mu, lv, h1, h2


if __name__ == "__main__":
    key = jax.random.PRNGKey(0)
    pkey, xkey, ekey = jax.random.split(key, 3)

    wslab, bslab, prelu_a, raw = init_params(pkey)

    B = 16                                              # 2 grid steps of TB=8 windows
    x = jax.random.uniform(xkey, (B, N_FEATS), jnp.float32)
    eps = jax.random.normal(ekey, (B, N_LATENT), jnp.float32)  # torch.randn_like analogue

    rec, mu, lv, hid = omni_anomaly_forward(x, eps, wslab, bslab, prelu_a)
    jax.block_until_ready((rec, mu, lv, hid))

    # shape / range checks
    assert rec.shape == (B, N_FEATS)
    assert mu.shape == (B, N_LATENT)
    assert lv.shape == (B, N_LATENT)
    assert hid.shape == (B, 2, 1, N_HIDDEN)
    assert bool(jnp.all(jnp.isfinite(rec)))
    assert bool(jnp.all((rec >= 0.0) & (rec <= 1.0)))   # sigmoid output range

    # numerical check against the full (unpruned) reference math
    r_rec, r_mu, r_lv, r_h1, r_h2 = _reference_forward(x, eps, raw)
    assert bool(jnp.allclose(rec, r_rec, atol=1e-5, rtol=1e-5))
    assert bool(jnp.allclose(mu, r_mu, atol=1e-5, rtol=1e-5))
    assert bool(jnp.allclose(lv, r_lv, atol=1e-5, rtol=1e-5))
    assert bool(jnp.allclose(hid[:, 0, 0, :], r_h1, atol=1e-5, rtol=1e-5))
    assert bool(jnp.allclose(hid[:, 1, 0, :], r_h2, atol=1e-5, rtol=1e-5))

    print("KERNEL_OK")
</pallas_src>

<mosaic_0001>
module attributes {stable_mosaic.version = 11 : i64} {
  func.func @omni_kernel(%arg0: i32, %arg1: memref<8x128xf32, #tpu.memory_space<vmem>>, %arg2: memref<216x128xf32, #tpu.memory_space<vmem>>, %arg3: memref<16x128xf32, #tpu.memory_space<vmem>>, %arg4: memref<4xf32, #tpu.memory_space<smem>>, %arg5: memref<8x128xf32, #tpu.memory_space<vmem>>) attributes {dimension_semantics = [#tpu.dimension_semantics<parallel>], iteration_bounds = array<i64: 2>, scalar_prefetch = 0 : i64, scratch_operands = 0 : i64, tpu.core_type = #tpu.core_type<tc>, window_params = [{transform_indices = @transform_0, window_bounds = array<i64: 8, 128>}, {pipeline_mode = #tpu.pipeline_mode<synchronous>, transform_indices = @transform_1, window_bounds = array<i64: 216, 128>}, {pipeline_mode = #tpu.pipeline_mode<synchronous>, transform_indices = @transform_2, window_bounds = array<i64: 16, 128>}, {transform_indices = @transform_3, window_bounds = array<i64: 4>}, {transform_indices = @transform_4, window_bounds = array<i64: 8, 128>}]} {
    %c0 = arith.constant 0 : index
    %c0_0 = arith.constant 0 : index
    %0 = vector.load %arg1[%c0, %c0_0] : memref<8x128xf32, #tpu.memory_space<vmem>>, vector<8x16xf32>
    %c0_1 = arith.constant 0 : index
    %c16 = arith.constant 16 : index
    %1 = vector.load %arg1[%c0_1, %c16] : memref<8x128xf32, #tpu.memory_space<vmem>>, vector<8x8xf32>
    %c0_2 = arith.constant 0 : index
    %c0_3 = arith.constant 0 : index
    %2 = vector.load %arg3[%c0_2, %c0_3] : memref<16x128xf32, #tpu.memory_space<vmem>>, vector<1x96xf32>
    %c1 = arith.constant 1 : index
    %c0_4 = arith.constant 0 : index
    %3 = vector.load %arg3[%c1, %c0_4] : memref<16x128xf32, #tpu.memory_space<vmem>>, vector<1x96xf32>
    %c2 = arith.constant 2 : index
    %c0_5 = arith.constant 0 : index
    %4 = vector.load %arg3[%c2, %c0_5] : memref<16x128xf32, #tpu.memory_space<vmem>>, vector<1x96xf32>
    %c3 = arith.constant 3 : index
    %c0_6 = arith.constant 0 : index
    %5 = vector.load %arg3[%c3, %c0_6] : memref<16x128xf32, #tpu.memory_space<vmem>>, vector<1x96xf32>
    %c4 = arith.constant 4 : index
    %c0_7 = arith.constant 0 : index
    %6 = vector.load %arg3[%c4, %c0_7] : memref<16x128xf32, #tpu.memory_space<vmem>>, vector<1x32xf32>
    %c5 = arith.constant 5 : index
    %c0_8 = arith.constant 0 : index
    %7 = vector.load %arg3[%c5, %c0_8] : memref<16x128xf32, #tpu.memory_space<vmem>>, vector<1x32xf32>
    %c6 = arith.constant 6 : index
    %c0_9 = arith.constant 0 : index
    %8 = vector.load %arg3[%c6, %c0_9] : memref<16x128xf32, #tpu.memory_space<vmem>>, vector<1x16xf32>
    %c7 = arith.constant 7 : index
    %c0_10 = arith.constant 0 : index
    %9 = vector.load %arg3[%c7, %c0_10] : memref<16x128xf32, #tpu.memory_space<vmem>>, vector<1x32xf32>
    %c8 = arith.constant 8 : index
    %c0_11 = arith.constant 0 : index
    %10 = vector.load %arg3[%c8, %c0_11] : memref<16x128xf32, #tpu.memory_space<vmem>>, vector<1x32xf32>
    %c9 = arith.constant 9 : index
    %c0_12 = arith.constant 0 : index
    %11 = vector.load %arg3[%c9, %c0_12] : memref<16x128xf32, #tpu.memory_space<vmem>>, vector<1x16xf32>
    %c0_13 = arith.constant 0 : index
    %12 = memref.load %arg4[%c0_13] : memref<4xf32, #tpu.memory_space<smem>>
    %c1_14 = arith.constant 1 : index
    %13 = memref.load %arg4[%c1_14] : memref<4xf32, #tpu.memory_space<smem>>
    %c2_15 = arith.constant 2 : index
    %14 = memref.load %arg4[%c2_15] : memref<4xf32, #tpu.memory_space<smem>>
    %c3_16 = arith.constant 3 : index
    %15 = memref.load %arg4[%c3_16] : memref<4xf32, #tpu.memory_space<smem>>
    %c0_17 = arith.constant 0 : index
    %c0_18 = arith.constant 0 : index
    %16 = vector.load %arg2[%c0_17, %c0_18] : memref<216x128xf32, #tpu.memory_space<vmem>>, vector<16x96xf32>
    %c16_19 = arith.constant 16 : index
    %c0_20 = arith.constant 0 : index
    %17 = vector.load %arg2[%c16_19, %c0_20] : memref<216x128xf32, #tpu.memory_space<vmem>>, vector<32x96xf32>
    %c48 = arith.constant 48 : index
    %c0_21 = arith.constant 0 : index
    %18 = vector.load %arg2[%c48, %c0_21] : memref<216x128xf32, #tpu.memory_space<vmem>>, vector<32x32xf32>
    %c80 = arith.constant 80 : index
    %c0_22 = arith.constant 0 : index
    %19 = vector.load %arg2[%c80, %c0_22] : memref<216x128xf32, #tpu.memory_space<vmem>>, vector<32x32xf32>
    %c112 = arith.constant 112 : index
    %c0_23 = arith.constant 0 : index
    %20 = vector.load %arg2[%c112, %c0_23] : memref<216x128xf32, #tpu.memory_space<vmem>>, vector<32x16xf32>
    %c144 = arith.constant 144 : index
    %c0_24 = arith.constant 0 : index
    %21 = vector.load %arg2[%c144, %c0_24] : memref<216x128xf32, #tpu.memory_space<vmem>>, vector<8x32xf32>
    %c152 = arith.constant 152 : index
    %c0_25 = arith.constant 0 : index
    %22 = vector.load %arg2[%c152, %c0_25] : memref<216x128xf32, #tpu.memory_space<vmem>>, vector<32x32xf32>
    %c184 = arith.constant 184 : index
    %c0_26 = arith.constant 0 : index
    %23 = vector.load %arg2[%c184, %c0_26] : memref<216x128xf32, #tpu.memory_space<vmem>>, vector<32x16xf32>
    %cst = arith.constant dense<0.000000e+00> : vector<8x96xf32>
    %24 = tpu.matmul %0, %16, %cst {dimension_numbers = #tpu.dot_dimension_numbers<[1], [0], [0], [1], [0, 0, 1, 1], [], []>} : vector<8x16xf32>, vector<16x96xf32>, vector<8x96xf32> -> vector<8x96xf32>
    %25 = vector.broadcast %2 : vector<1x96xf32> to vector<8x96xf32>
    %26 = arith.addf %24, %25 : vector<8x96xf32>
    %27 = vector.extract_strided_slice %26 {offsets = [0, 0], sizes = [8, 32], strides = [1, 1]} : vector<8x96xf32> to vector<8x32xf32>
    %28 = vector.extract_strided_slice %3 {offsets = [0, 0], sizes = [1, 32], strides = [1, 1]} : vector<1x96xf32> to vector<1x32xf32>
    %29 = vector.broadcast %28 : vector<1x32xf32> to vector<8x32xf32>
    %30 = arith.addf %27, %29 : vector<8x32xf32>
    %31 = arith.negf %30 : vector<8x32xf32>
    %32 = math.exp %31 : vector<8x32xf32>
    %cst_27 = arith.constant 1.000000e+00 : f32
    %33 = vector.broadcast %cst_27 : f32 to vector<8x32xf32>
    %34 = arith.addf %33, %32 : vector<8x32xf32>
    %35 = arith.divf %33, %34 : vector<8x32xf32>
    %36 = vector.extract_strided_slice %26 {offsets = [0, 32], sizes = [8, 32], strides = [1, 1]} : vector<8x96xf32> to vector<8x32xf32>
    %37 = vector.extract_strided_slice %3 {offsets = [0, 32], sizes = [1, 32], strides = [1, 1]} : vector<1x96xf32> to vector<1x32xf32>
    %38 = vector.broadcast %37 : vector<1x32xf32> to vector<8x32xf32>
    %39 = arith.addf %36, %38 : vector<8x32xf32>
    %40 = arith.negf %39 : vector<8x32xf32>
    %41 = math.exp %40 : vector<8x32xf32>
    %cst_28 = arith.constant 1.000000e+00 : f32
    %42 = vector.broadcast %cst_28 : f32 to vector<8x32xf32>
    %43 = arith.addf %42, %41 : vector<8x32xf32>
    %44 = arith.divf %42, %43 : vector<8x32xf32>
    %45 = vector.extract_strided_slice %26 {offsets = [0, 64], sizes = [8, 32], strides = [1, 1]} : vector<8x96xf32> to vector<8x32xf32>
    %46 = vector.extract_strided_slice %3 {offsets = [0, 64], sizes = [1, 32], strides = [1, 1]} : vector<1x96xf32> to vector<1x32xf32>
    %47 = vector.broadcast %46 : vector<1x32xf32> to vector<8x32xf32>
    %48 = arith.mulf %35, %47 : vector<8x32xf32>
    %49 = arith.addf %45, %48 : vector<8x32xf32>
    %50 = math.tanh %49 : vector<8x32xf32>
    %cst_29 = arith.constant 1.000000e+00 : f32
    %51 = vector.broadcast %cst_29 : f32 to vector<8x32xf32>
    %52 = arith.subf %51, %44 : vector<8x32xf32>
    %53 = arith.mulf %52, %50 : vector<8x32xf32>
    %cst_30 = arith.constant dense<0.000000e+00> : vector<8x96xf32>
    %54 = tpu.matmul %53, %17, %cst_30 {dimension_numbers = #tpu.dot_dimension_numbers<[1], [0], [0], [1], [0, 0, 1, 1], [], []>} : vector<8x32xf32>, vector<32x96xf32>, vector<8x96xf32> -> vector<8x96xf32>
    %55 = vector.broadcast %4 : vector<1x96xf32> to vector<8x96xf32>
    %56 = arith.addf %54, %55 : vector<8x96xf32>
    %57 = vector.extract_strided_slice %56 {offsets = [0, 0], sizes = [8, 32], strides = [1, 1]} : vector<8x96xf32> to vector<8x32xf32>
    %58 = vector.extract_strided_slice %5 {offsets = [0, 0], sizes = [1, 32], strides = [1, 1]} : vector<1x96xf32> to vector<1x32xf32>
    %59 = vector.broadcast %58 : vector<1x32xf32> to vector<8x32xf32>
    %60 = arith.addf %57, %59 : vector<8x32xf32>
    %61 = arith.negf %60 : vector<8x32xf32>
    %62 = math.exp %61 : vector<8x32xf32>
    %cst_31 = arith.constant 1.000000e+00 : f32
    %63 = vector.broadcast %cst_31 : f32 to vector<8x32xf32>
    %64 = arith.addf %63, %62 : vector<8x32xf32>
    %65 = arith.divf %63, %64 : vector<8x32xf32>
    %66 = vector.extract_strided_slice %56 {offsets = [0, 32], sizes = [8, 32], strides = [1, 1]} : vector<8x96xf32> to vector<8x32xf32>
    %67 = vector.extract_strided_slice %5 {offsets = [0, 32], sizes = [1, 32], strides = [1, 1]} : vector<1x96xf32> to vector<1x32xf32>
    %68 = vector.broadcast %67 : vector<1x32xf32> to vector<8x32xf32>
    %69 = arith.addf %66, %68 : vector<8x32xf32>
    %70 = arith.negf %69 : vector<8x32xf32>
    %71 = math.exp %70 : vector<8x32xf32>
    %cst_32 = arith.constant 1.000000e+00 : f32
    %72 = vector.broadcast %cst_32 : f32 to vector<8x32xf32>
    %73 = arith.addf %72, %71 : vector<8x32xf32>
    %74 = arith.divf %72, %73 : vector<8x32xf32>
    %75 = vector.extract_strided_slice %56 {offsets = [0, 64], sizes = [8, 32], strides = [1, 1]} : vector<8x96xf32> to vector<8x32xf32>
    %76 = vector.extract_strided_slice %5 {offsets = [0, 64], sizes = [1, 32], strides = [1, 1]} : vector<1x96xf32> to vector<1x32xf32>
    %77 = vector.broadcast %76 : vector<1x32xf32> to vector<8x32xf32>
    %78 = arith.mulf %65, %77 : vector<8x32xf32>
    %79 = arith.addf %75, %78 : vector<8x32xf32>
    %80 = math.tanh %79 : vector<8x32xf32>
    %cst_33 = arith.constant 1.000000e+00 : f32
    %81 = vector.broadcast %cst_33 : f32 to vector<8x32xf32>
    %82 = arith.subf %81, %74 : vector<8x32xf32>
    %83 = arith.mulf %82, %80 : vector<8x32xf32>
    %cst_34 = arith.constant dense<0.000000e+00> : vector<8x32xf32>
    %84 = tpu.matmul %83, %18, %cst_34 {dimension_numbers = #tpu.dot_dimension_numbers<[1], [0], [0], [1], [0, 0, 1, 1], [], []>} : vector<8x32xf32>, vector<32x32xf32>, vector<8x32xf32> -> vector<8x32xf32>
    %85 = vector.broadcast %6 : vector<1x32xf32> to vector<8x32xf32>
    %86 = arith.addf %84, %85 : vector<8x32xf32>
    %cst_35 = arith.constant 0.000000e+00 : f32
    %87 = vector.broadcast %cst_35 : f32 to vector<8x32xf32>
    %88 = arith.cmpf oge, %86, %87 : vector<8x32xf32>
    %89 = vector.broadcast %12 : f32 to vector<8x32xf32>
    %90 = arith.mulf %89, %86 : vector<8x32xf32>
    %91 = arith.select %88, %86, %90 : vector<8x32xi1>, vector<8x32xf32>
    %cst_36 = arith.constant dense<0.000000e+00> : vector<8x32xf32>
    %92 = tpu.matmul %91, %19, %cst_36 {dimension_numbers = #tpu.dot_dimension_numbers<[1], [0], [0], [1], [0, 0, 1, 1], [], []>} : vector<8x32xf32>, vector<32x32xf32>, vector<8x32xf32> -> vector<8x32xf32>
    %93 = vector.broadcast %7 : vector<1x32xf32> to vector<8x32xf32>
    %94 = arith.addf %92, %93 : vector<8x32xf32>
    %cst_37 = arith.constant 0.000000e+00 : f32
    %95 = vector.broadcast %cst_37 : f32 to vector<8x32xf32>
    %96 = arith.cmpf oge, %94, %95 : vector<8x32xf32>
    %97 = vector.broadcast %13 : f32 to vector<8x32xf32>
    %98 = arith.mulf %97, %94 : vector<8x32xf32>
    %99 = arith.select %96, %94, %98 : vector<8x32xi1>, vector<8x32xf32>
    %cst_38 = arith.constant dense<0.000000e+00> : vector<8x16xf32>
    %100 = tpu.matmul %99, %20, %cst_38 {dimension_numbers = #tpu.dot_dimension_numbers<[1], [0], [0], [1], [0, 0, 1, 1], [], []>} : vector<8x32xf32>, vector<32x16xf32>, vector<8x16xf32> -> vector<8x16xf32>
    %101 = vector.broadcast %8 : vector<1x16xf32> to vector<8x16xf32>
    %102 = arith.addf %100, %101 : vector<8x16xf32>
    %103 = vector.extract_strided_slice %102 {offsets = [0, 0], sizes = [8, 8], strides = [1, 1]} : vector<8x16xf32> to vector<8x8xf32>
    %104 = vector.extract_strided_slice %102 {offsets = [0, 8], sizes = [8, 8], strides = [1, 1]} : vector<8x16xf32> to vector<8x8xf32>
    %cst_39 = arith.constant 5.000000e-01 : f32
    %105 = vector.broadcast %cst_39 : f32 to vector<8x8xf32>
    %106 = arith.mulf %105, %104 : vector<8x8xf32>
    %107 = math.exp %106 : vector<8x8xf32>
    %108 = arith.mulf %1, %107 : vector<8x8xf32>
    %109 = arith.addf %103, %108 : vector<8x8xf32>
    %cst_40 = arith.constant dense<0.000000e+00> : vector<8x32xf32>
    %110 = tpu.matmul %109, %21, %cst_40 {dimension_numbers = #tpu.dot_dimension_numbers<[1], [0], [0], [1], [0, 0, 1, 1], [], []>} : vector<8x8xf32>, vector<8x32xf32>, vector<8x32xf32> -> vector<8x32xf32>
    %111 = vector.broadcast %9 : vector<1x32xf32> to vector<8x32xf32>
    %112 = arith.addf %110, %111 : vector<8x32xf32>
    %cst_41 = arith.constant 0.000000e+00 : f32
    %113 = vector.broadcast %cst_41 : f32 to vector<8x32xf32>
    %114 = arith.cmpf oge, %112, %113 : vector<8x32xf32>
    %115 = vector.broadcast %14 : f32 to vector<8x32xf32>
    %116 = arith.mulf %115, %112 : vector<8x32xf32>
    %117 = arith.select %114, %112, %116 : vector<8x32xi1>, vector<8x32xf32>
    %cst_42 = arith.constant dense<0.000000e+00> : vector<8x32xf32>
    %118 = tpu.matmul %117, %22, %cst_42 {dimension_numbers = #tpu.dot_dimension_numbers<[1], [0], [0], [1], [0, 0, 1, 1], [], []>} : vector<8x32xf32>, vector<32x32xf32>, vector<8x32xf32> -> vector<8x32xf32>
    %119 = vector.broadcast %10 : vector<1x32xf32> to vector<8x32xf32>
    %120 = arith.addf %118, %119 : vector<8x32xf32>
    %cst_43 = arith.constant 0.000000e+00 : f32
    %121 = vector.broadcast %cst_43 : f32 to vector<8x32xf32>
    %122 = arith.cmpf oge, %120, %121 : vector<8x32xf32>
    %123 = vector.broadcast %15 : f32 to vector<8x32xf32>
    %124 = arith.mulf %123, %120 : vector<8x32xf32>
    %125 = arith.select %122, %120, %124 : vector<8x32xi1>, vector<8x32xf32>
    %cst_44 = arith.constant dense<0.000000e+00> : vector<8x16xf32>
    %126 = tpu.matmul %125, %23, %cst_44 {dimension_numbers = #tpu.dot_dimension_numbers<[1], [0], [0], [1], [0, 0, 1, 1], [], []>} : vector<8x32xf32>, vector<32x16xf32>, vector<8x16xf32> -> vector<8x16xf32>
    %127 = vector.broadcast %11 : vector<1x16xf32> to vector<8x16xf32>
    %128 = arith.addf %126, %127 : vector<8x16xf32>
    %129 = arith.negf %128 : vector<8x16xf32>
    %130 = math.exp %129 : vector<8x16xf32>
    %cst_45 = arith.constant 1.000000e+00 : f32
    %131 = vector.broadcast %cst_45 : f32 to vector<8x16xf32>
    %132 = arith.addf %131, %130 : vector<8x16xf32>
    %133 = arith.divf %131, %132 : vector<8x16xf32>
    %cst_46 = arith.constant 0.000000e+00 : f32
    %134 = vector.broadcast %cst_46 : f32 to vector<8x32xf32>
    %135 = tpu.concatenate %133, %103, %104, %53, %83, %134 in 1 : vector<8x16xf32>, vector<8x8xf32>, vector<8x8xf32>, vector<8x32xf32>, vector<8x32xf32>, vector<8x32xf32> -> vector<8x128xf32>
    %c0_47 = arith.constant 0 : index
    %c0_48 = arith.constant 0 : index
    %136 = vector.load %arg5[%c0_47, %c0_48] : memref<8x128xf32, #tpu.memory_space<vmem>>, vector<8x128xf32>
    tpu.vector_store %arg5[%c0_47, %c0_48], %135 {strides = array<i32>} : memref<8x128xf32, #tpu.memory_space<vmem>>, vector<8x128xf32>,
    return
  }
  func.func @transform_0(%arg0: i32) -> (i32, i32) {
    %c0_i32 = arith.constant 0 : i32
    %c0_i32_0 = arith.constant 0 : i32
    return %arg0, %c0_i32 : i32, i32
  }
  func.func @transform_1(%arg0: i32) -> (i32, i32) {
    %c0_i32 = arith.constant 0 : i32
    %c0_i32_0 = arith.constant 0 : i32
    %c0_i32_1 = arith.constant 0 : i32
    return %c0_i32, %c0_i32_0 : i32, i32
  }
  func.func @transform_2(%arg0: i32) -> (i32, i32) {
    %c0_i32 = arith.constant 0 : i32
    %c0_i32_0 = arith.constant 0 : i32
    %c0_i32_1 = arith.constant 0 : i32
    return %c0_i32, %c0_i32_0 : i32, i32
  }
  func.func @transform_3(%arg0: i32) -> i32 {
    %c0_i32 = arith.constant 0 : i32
    %c0_i32_0 = arith.constant 0 : i32
    return %c0_i32 : i32
  }
  func.func @transform_4(%arg0: i32) -> (i32, i32) {
    %c0_i32 = arith.constant 0 : i32
    %c0_i32_0 = arith.constant 0 : i32
    return %arg0, %c0_i32 : i32, i32
  }
}

</mosaic_0001>

<bundles_post_ra>
// kernel: tpu_custom_call.1
= control target key start
LH: loop header
LB: loop body
LE: loop exit
PB: predicated region body
PF: predicated region fallthrough
CT: control target
= control target key end

     0   :  { %9 = vsyncpa [#allocation3], 0  ;;  %s1878_s0 = inlined_call_operand.hbm [shape: f32[16,128], index: 0, kind: input, shape index: {}]   ;;  %s1879_s1 = inlined_call_operand.hbm [shape: f32[216,128], index: 1, kind: input, shape index: {}]   ;;  %s1880_s2 = inlined_call_operand.hbm [shape: f32[16,128], index: 2, kind: input, shape index: {}]   ;;  %s1881_s3 = inlined_call_operand.vmem [shape: f32[4], index: 3, kind: input, shape index: {}]   ;;  %s1882_s4 = inlined_call_operand.hbm [shape: f32[16,128], index: 4, kind: output, shape index: {}]  }
   0x1   :  { %11 = vsyncpa [#allocation3 + $0x1], 0 }
   0x2   :  { %12 = vsyncpa [#allocation7], 0 }
   0x3   :  { %13 = vsyncpa [#allocation5], 0 }
   0x4   :  { %14 = vsyncpa [#allocation4], 0 }
   0x5   :  { %16 = vsyncpa [#allocation4 + $0x1], 0  ;;  %s1612_s15 = smov 0   ;;  %s1614_s16 = smov 0  }
   0x6   :  { %s1616_s17 = smov 0   ;;  %s1618_s18 = smov 0  }
   0x7 LB: > { %s1633_s19 = sadd.s32 4294967295, %s1570_s18   ;;  %s1143_s20 = sadd.s32 4294967294, %s1570_s18   ;;  %s1570_s18 = sphi %s1618_s18, %s1906_s18   ;;  %s1566_s17 = sphi %s1616_s17, %s1905_s17   ;;  %s1562_s16 = sphi %s1614_s16, %s1904_s16   ;;  %s1558_s15 = sphi %s1612_s15, %s1903_s15  }
   0x8   : > { %p42_p0 = scmp.ne.s32.totalorder %s1562_s16, %s1558_s15  ;;  %p1883_p1 = scmp.eq.s32.totalorder %s1633_s19, 0 }
   0x9   : > { %p135_p3 = scmp.eq.s32.totalorder %s1143_s20, 1  ;;  %p1144_p5 = scmp.ge.s32.totalorder %s1570_s18, 1 }
   0xa   : > { %p1642_p4 = por %p1883_p1, %p42_p0  ;;  %p142_p7 = scmp.lt.s32.totalorder %s1570_s18, 3 }
   0xb   : > { %p1647_p6 = por %p135_p3, %p42_p0  ;;  %s1572_s24 = smov [#allocation6]  }
   0xc   : > { %s1887_s21 = scalar_select %p1642_p4, 1, 0 }
   0xd   : > { %s1888_s22 = scalar_select %p1647_p6, 1, 0 }
   0xe   : > { %p1652_p8 = pnand %p1144_p5, %p142_p7  ;;  %s154_s25 = sshll.u32 %s1572_s24, 4  ;;  %s155_s25 = int_to_ptr.vmem [resolvable:$true] %s154_s25 }
   0xf   : > { %s1573_s27 = smov [#allocation8]   ;;  %s181_s5 = sshll.u32 %s1881_s3, 4  ;;  %s1668_s5 = int_to_ptr.vmem [resolvable:$true] %s181_s5 }
  0x10   : > { %s1889_s23 = scalar_select %p1652_p8, 1, 0 }
  0x11   : > { %p1314_p9 = pneg %p1652_p8  ;;  %s167_s28 = sshll.u32 %s1573_s27, 4  ;;  %s168_s28 = int_to_ptr.vmem [resolvable:$true] %s167_s28 }
  0x12   : > { %s1414_s6 = scalar_lea.vmem %s155_s25, 3456  ;;  %p1422_p5 = scmp.lt.s32.totalorder %s155_s25, %s155_s25 }
  0x13   : > { %p1661_p11 = pnand %p1314_p9, %p1883_p1  ;;  %p1415_p13 = scmp.ne.s32.totalorder %s155_s25, %s1414_s6 }
  0x14   : > { %p1423_p7 = scmp.lt.s32.totalorder %s1414_s6, %s1414_s6 }
  0x15   : > { %p1405_p12 = pneg %p1661_p11 }
  0x16   : > { %p1424_p9 = por %p1423_p7, %p1422_p5 }
  0x17   : > { %p1417_p0 = pnand %p1415_p13, %p1405_p12 }
  0x19   : > { %p1418_p3 = pneg %p1417_p0 }
  0x1b   : > { %p1425_p10 = pnand %p1424_p9, %p1418_p3 }
  0x1d   : > { %1428 = shalt.err (!%p1425_p10)
}
  0x1e   : > { %s1574_s7 = smov 128   ;;  %s1575_s8 = smov 8  }
  0x1f   : > { %1317 = dma.hbm_to_vmem [thread:$0]  (!%p1661_p11), %s1879_s1, 3456, %s155_s25, [#allocation7], %s1574_s7, %s1574_s7, %s1575_s8  }
  0x20   : > { %s1440_s11 = scalar_lea.vmem %s168_s28, 256  ;;  %p1448_p2 = scmp.lt.s32.totalorder %s168_s28, %s168_s28 }
  0x21   : > { %p1441_p1 = scmp.ne.s32.totalorder %s168_s28, %s1440_s11  ;;  %p1449_p6 = scmp.lt.s32.totalorder %s1440_s11, %s1440_s11 }
  0x23   : > { %p1443_p13 = pnand %p1441_p1, %p1405_p12  ;;  %p1450_p5 = por %p1449_p6, %p1448_p2 }
  0x25   : > { %p1444_p0 = pneg %p1443_p13 }
  0x27   : > { %p1451_p3 = pnand %p1450_p5, %p1444_p0 }
  0x29   : > { %1454 = shalt.err (!%p1451_p3)
}
  0x2a   : > { %1320 = dma.hbm_to_vmem [thread:$0]  (!%p1661_p11), %s1880_s2, 256, %s168_s28, [#allocation7], %s1574_s7, %s1574_s7, %s1575_s8  }
  0x2b   : > { %s1455_s14 = scalar_lea.vmem %s1668_s5, 16  ;;  %p1463_p2 = scmp.lt.s32.totalorder %s1668_s5, %s1668_s5 }
  0x2c   : > { %p1456_p10 = scmp.ne.s32.totalorder %s1668_s5, %s1455_s14  ;;  %p1464_p6 = scmp.lt.s32.totalorder %s1455_s14, %s1455_s14 }
  0x2e   : > { %p1458_p1 = pnand %p1456_p10, %p1405_p12  ;;  %p1465_p9 = por %p1464_p6, %p1463_p2 }
  0x30   : > { %p1459_p7 = pneg %p1458_p1 }
  0x32   : > { %p1466_p13 = pnand %p1465_p9, %p1459_p7 }
  0x34   : > { %1469 = shalt.err (!%p1466_p13)
}
  0x35   : > { %s1576_s20 = smov [#allocation9]   ;;  %s1699_s24 = sadd.s32 1, %s1570_s18  }
  0x36   : > { %1323 = dma.vmem_to_smem (!%p1661_p11), %s1668_s5, 16, %s1576_s20, [#allocation5]  }
  0x37   : > { %s26_s25 = ssub.s32 %s1570_s18, %s1699_s24  ;;  %s29_s27 = sadd.s32 1, %s1566_s17 }
  0x38   : > { %p27_p12 = scmp.eq.s32.totalorder %s26_s25, 0  ;;  %p36_p0 = scmp.ne.s32.totalorder %s1566_s17, %s1562_s16 }
  0x39   : > { %p37_p5 = scmp.eq.s32.totalorder %s1570_s18, 0  ;;  %p1335_p3 = scmp.lt.s32.totalorder %s1570_s18, 2 }
  0x3a   : > { %s1709_s26 = scalar_select %p27_p12, %s1566_s17, %s29_s27  }
  0x3b   : > { %p38_p10 = por %p37_p5, %p36_p0  ;;  %p1891_p1 = scmp.eq.s32.totalorder %s1633_s19, 1 }
  0x3c   : > { %s192_s29 = sand.u32 1, %s1566_s17   ;;  %s1150_s30 = sshll.u32 %s1570_s18, 7 }
  0x3d   : > { %p1713_p7 = por %p1891_p1, %p36_p0  ;;  %s1149_s5 = sshll.u32 %s192_s29, 3 }
  0x3e   : > { %s1722_s8 = scalar_lea.hbm %s1878_s0, %s1150_s30  ;;  %s196_s9 = scalar_lea.vmem [#allocation2], %s1149_s5 }
  0x3f   : > { %s1892_s28 = scalar_select %p1713_p7, 1, 0 }
  0x40   : > { %s203_s10 = sshll.u32 %s196_s9, 4  ;;  %p1724_p11 = pnand %p1335_p3, %p38_p10  ;;  %s204_s10 = int_to_ptr.vmem [resolvable:$true] %s203_s10 }
  0x41   : > { %s193_s12 = scalar_lea.sflag [#allocation3], %s192_s29  ;;  %s1470_s13 = scalar_lea.hbm %s1722_s8, 128 }
  0x42   : > { %p1471_p2 = scmp.ne.s32.totalorder %s1722_s8, %s1470_s13  ;;  %p1472_p6 = pneg %p1724_p11 }
  0x43   : > { %s1475_s25 = scalar_lea.hbm %s1878_s0, 256  ;;  %p1476_p12 = scmp.lt.s32.totalorder %s1722_s8, %s1878_s0 }
  0x44   : > { %p1473_p9 = pnand %p1472_p6, %p1471_p2  ;;  %p1477_p0 = scmp.lt.s32.totalorder %s1475_s25, %s1470_s13 }
  0x46   : > { %p1474_p13 = pneg %p1473_p9  ;;  %p1478_p5 = por %p1477_p0, %p1476_p12 }
  0x48   : > { %p1479_p3 = pnand %p1478_p5, %p1474_p13 }
  0x4a   : > { %1482 = shalt.err (!%p1479_p3)
}
  0x4b   : > { %s1483_s5 = scalar_lea.vmem %s204_s10, 128  ;;  %s1577_s29 = smov [#allocation2]  }
  0x4c   : > { %p1484_p10 = scmp.ne.s32.totalorder %s204_s10, %s1483_s5  ;;  %s1488_s6 = sshll.u32 %s1577_s29, 4  ;;  %s1489_s6 = int_to_ptr.vmem [resolvable:$false] %s1488_s6 }
  0x4d   : > { %s1490_s7 = scalar_lea.vmem %s1489_s6, 256  ;;  %p1491_p2 = scmp.lt.s32.totalorder %s204_s10, %s1489_s6 }
  0x4e   : > { %p1486_p1 = pnand %p1484_p10, %p1472_p6  ;;  %p1492_p9 = scmp.lt.s32.totalorder %s1490_s7, %s1483_s5 }
  0x50   : > { %p1487_p7 = pneg %p1486_p1  ;;  %p1493_p4 = por %p1492_p9, %p1491_p2 }
  0x52   : > { %p1494_p8 = pnand %p1493_p4, %p1487_p7 }
  0x54   : > { %1497 = shalt.err (!%p1494_p8)
}
  0x55   : > { %1327 = dma.hbm_to_vmem [thread:$0]  (!%p1724_p11), %s1722_s8, 128, %s204_s10, %s193_s12  }
  0x56   : > { %p1894_p13 = scmp.ne.s32.totalorder %s1889_s23, 0 }
  0x57   : > { %s1745_s9 = sand.u32 (!%p1894_p13), 1, %s1562_s16   ;;  %p1895_p4 = scmp.ne.s32.totalorder (!%p1894_p13), %s1887_s21, 0 }
  0x58   : > { %212 = sbr.rel (%p1894_p13) target bundleno = 2780 (0xadc), region = 36  ;;  %s1152_s13 = sshll.u32 (!%p1894_p13), %s1745_s9, 3 }
  0x59   : > { %s215_s14 = scalar_lea.sflag (!%p1894_p13), [#allocation3], %s1745_s9  ;;  %s218_s20 = scalar_lea.vmem (!%p1894_p13), [#allocation2], %s1152_s13 }
  0x5d   : > { %1541 = dma.done.wait (%p1895_p4), %s215_s14, 128  }
  0x5e   : > { %1543 = vsyncadd (%p1895_p4), %s215_s14, 4294967168  ;;  %p1896_p8 = scmp.eq.s32.totalorder %s1633_s19, 0 }
  0x60   : > { %1545 = dma.done.wait (%p1896_p8), [#allocation7], 3712   ;;  %p1897_p7 = pmov %p1896_p8 }
  0x62   : > { %1547 = vsyncadd (%p1897_p7), [#allocation7], 4294963584  ;;  %p1898_p11 = pmov %p1897_p7 }
  0x63   : > { %p1899_p6 = pmov %p1897_p7 }
  0x64   : > { %1549 = dma.done.wait (%p1898_p11), [#allocation5], 16  }
  0x65   : > { %1551 = vsyncadd (%p1899_p6), [#allocation5], 4294967280 }
  0x66   : > { %235 = sfence }
  0x67   : > { %v272_v0 = vld [vmem:[#allocation6 + $0x8] sm:$0xff]  ;;  %v1578_v1 = vmov 0.0   ;;  %v271_v2 = vld [vmem:[#allocation6] sm:$0xff]  ;;  %vm1579_vm0 = vmmov 0   ;;  %v1162_v3 = vld [vmem:[#allocation8 + $0x1] ss:$0 sm:$0xff] }
  0x68   : > { %1220 = vmatprep.subr.mxu0 %v1578_v1  ;;  %1224 = vmatprep.mubr.msk.f32.mxu0 %vm1579_vm0, %v1578_v1  ;;  %v1766_v4 = vld [vmem:[%s218_s20] sm:$0xff]  ;;  %vm302_vm1 = vcmask 130048   ;;  %s1580_s21 = smov 64   ;;  %v276_v18 = vld [vmem:[#allocation6 + $0x28] sm:$0xff]  ;;  %v275_v19 = vld [vmem:[#allocation6 + $0x20] sm:$0xff]  ;;  %s1581_s23 = smov 96  }
  0x69   : > { %1221 = vmatpush3.msra.mxu0 %v272_v0  ;;  %388 = vrot.lane.b32.xlu0 %v1162_v3, %s1580_s21  ;;  %v1160_v5 = vld [vmem:[#allocation8] ss:$0 sm:$0xff]  ;;  %v273_v21 = vld [vmem:[#allocation6 + $0x10] sm:$0xff]  ;;  %v1166_v23 = vld [vmem:[#allocation8 + $0x3] ss:$0 sm:$0xff]  ;;  %vm411_vm2 = vcmask 261120  }
  0x6a   : > { %1222 = vmatprep.subr.mxu0 %v1578_v1  ;;  %1227 = vmatprep.subr.mxu1 %v1578_v1  ;;  %v274_v20 = vld [vmem:[#allocation6 + $0x18] sm:$0xff]  ;;  %v280_v41 = vld [vmem:[#allocation6 + $0x48] sm:$0xff]  ;;  %v279_v42 = vld [vmem:[#allocation6 + $0x40] sm:$0xff]  ;;  %s267_s8 = sld [smem:[#allocation9]]  ;;  %s1582_s11 = smov 8   ;;  %vm770_vm5 = vcmask 64512  }
  0x6b   : > { %1223 = vmatpush3.msra.mxu0 %v271_v2  ;;  %1235 = vmatprep.mubr.msk.f32.mxu1 %vm1579_vm0, %v1578_v1  ;;  %v1164_v28 = vld [vmem:[#allocation8 + $0x2] ss:$0 sm:$0xff]  ;;  %v277_v44 = vld [vmem:[#allocation6 + $0x30] sm:$0xff]  ;;  %v284_v46 = vld [vmem:[#allocation6 + $0x68] sm:$0xff]  ;;  %s1157_s10 = sld [smem:[#allocation9 + $0x1]]  ;;  %s1583_s12 = smov 16  }
  0x6c   : > { %1225 = vmatmul.mubr.msk.f32.vlgmr.msra.gmra.mxu0 %vm302_vm1, %v1766_v4  ;;  %1238 = vmatprep.subr.mxu0 %v1578_v1  ;;  %v278_v43 = vld [vmem:[#allocation6 + $0x38] sm:$0xff]  ;;  %v283_v51 = vld [vmem:[#allocation6 + $0x60] sm:$0xff]  ;;  %v281_v53 = vld [vmem:[#allocation6 + $0x50] sm:$0xff]  ;;  %s1584_s25 = smov 112   ;;  %s1585_s27 = smov 32   ;;  %vm1020_vm8 = vcmask 195584  }
  0x6d   : > { %1246 = vmatprep.mubr.msk.f32.mxu0 %vm1579_vm0, %v1578_v1  ;;  %1228 = vmatpush3.msra.mxu1 %v276_v18  ;;  %v282_v52 = vld [vmem:[#allocation6 + $0x58] sm:$0xff]  ;;  %v288_v54 = vld [vmem:[#allocation6 + $0x88] sm:$0xff]  ;;  %v287_v62 = vld [vmem:[#allocation6 + $0x80] sm:$0xff]  ;;  %s1158_s30 = sld [smem:[#allocation9 + $0x2]]  ;;  %vm1023_vm9 = vcmask 523264   ;;  %s1182_s29 = sshll.u32 %s1633_s19, 7 }
  0x6e   : > { %1229 = vmatprep.subr.mxu1 %v1578_v1  ;;  %1239 = vmatpush3.msra.mxu0 %v280_v41  ;;  %v1168_v55 = vld [vmem:[#allocation8 + $0x4] ss:$0 sm:$0xff]  ;;  %v285_v0 = vld [vmem:[#allocation6 + $0x70] sm:$0xff]  ;;  %v1170_v2 = vld [vmem:[#allocation8 + $0x5] ss:$0 sm:$0xff]  ;;  %s1159_s5 = sld [smem:[#allocation9 + $0x3]] }
  0x6f   : > { %1230 = vmatpush3.msra.mxu1 %v275_v19  ;;  %1240 = vmatprep.subr.mxu0 %v1578_v1  ;;  %v286_v63 = vld [vmem:[#allocation6 + $0x78] sm:$0xff]  ;;  %v293_v18 = vld [vmem:[#allocation6 + $0xb0] sm:$0xff]  ;;  %s255_s6 = scalar_lea.vmem [#allocation10], %s1152_s13  ;;  %vm1025_vm10 = vcmask 785408   ;;  %p1900_p0 = scmp.ne.s32.totalorder %s1892_s28, 0 }
  0x70   : > { %1231 = vmatprep.subr.mxu1 %v1578_v1  ;;  %1241 = vmatpush3.msra.mxu0 %v279_v42  ;;  %v592_v57 = vstv %s267_s8  ;;  %s1042_s7 = sshll.u32 %s255_s6, 4  ;;  %s1586_s13 = smov [#allocation10]   ;;  %s1043_s7 = int_to_ptr.vmem [resolvable:$true] %s1042_s7 }
  0x71   : > { %1232 = vmatpush3.msra.mxu1 %v274_v20  ;;  %1242 = vmatprep.subr.mxu0 %v1578_v1  ;;  %s1498_s19 = scalar_lea.vmem %s1043_s7, 128  ;;  %s1502_s8 = sshll.u32 %s1586_s13, 4  ;;  %s1503_s8 = int_to_ptr.vmem [resolvable:$false] %s1502_s8 }
  0x72   : > { %1233 = vmatprep.subr.mxu1 %v1578_v1  ;;  %1243 = vmatpush3.msra.mxu0 %v278_v43  ;;  %p1499_p12 = scmp.ne.s32.totalorder %s1043_s7, %s1498_s19  ;;  %p1505_p10 = scmp.lt.s32.totalorder %s1043_s7, %s1503_s8 }
  0x73   : > { %1234 = vmatpush3.msra.mxu1 %v273_v21  ;;  %1244 = vmatprep.subr.mxu0 %v1578_v1 }
  0x74   : > { %1249 = vmatprep.subr.mxu1 %v1578_v1  ;;  %1245 = vmatpush3.msra.mxu0 %v277_v44  ;;  %v1178_v44 = vld [vmem:[#allocation8 + $0x9] ss:$0 sm:$0xff]  ;;  %p1500_p5 = pnand %p1499_p12, %p1900_p0 }
  0x75   : > { %1260 = vmatprep.subr.mxu0 %v1578_v1 }
  0x76   : > { %p1501_p3 = pneg %p1500_p5 }
  0xdb   : > { %v389_v13 = vpop.permute.xlu0 %388 }
 0x12c   : > { %v372_v6 = vpop.f32.mrf.mxu0 }
 0x12d   : > { %v373_v7 = vadd.f32 %v1160_v5, %v372_v6  ;;  %v673_v5 = vstv %s1157_s10  ;;  %s1504_s10 = scalar_lea.vmem %s1503_s8, 256 }
 0x12e   : > { %v1226_v8 = vpop.f32.mrf.mxu0  ;;  %p1506_p1 = scmp.lt.s32.totalorder %s1504_s10, %s1498_s19 }
 0x12f   : > { %v380_v9 = vadd.f32 %v1162_v3, %v373_v7 }
 0x130   : > { %p1507_p2 = por %p1506_p1, %p1505_p10 }
 0x131   : > { %v1163_v10 = vmul.f32 -1.442695, %v380_v9 }
 0x132   : > { %p1508_p9 = pnand %p1507_p2, %p1501_p3 }
 0x133   : > { %1385 = vpow2.f32 %v1163_v10  ;;  %v1172_v10 = vld [vmem:[#allocation8 + $0x6] ss:$0 sm:$0xff] }
 0x140   : > { %v1386_v11 = vpop.eup %1385 }
 0x141   : > { %v384_v12 = vadd.f32 1.0, %v1386_v11 }
 0x143   : > { %1387 = vrcp.f32 %v384_v12 }
 0x150   : > { %v1388_v14 = vpop.eup %1387 }
 0x151   : > { %v391_v15 = vmul.f32 %v1388_v14, %v389_v13  ;;  %v398_v24 = vsub.f32 1.0, %v1388_v14 }
 0x153   : > { %393 = vrot.lane.b32.xlu0 %v391_v15, %s1580_s21 }
 0x157   : > { %496 = vrot.lane.b32.xlu0 %v1166_v23, %s1580_s21 }
 0x1c5   : > { %v394_v16 = vpop.permute.xlu0 %393 }
 0x1c6   : > { %v396_v17 = vadd.f32 %v394_v16, %v373_v7  ;;  %v289_v16 = vld [vmem:[#allocation6 + $0x90] sm:$0xff] }
 0x1c8   : > { %1389 = vtanh.f32 %v396_v17 }
 0x1c9   : > { %v497_v36 = vpop.permute.xlu0 %496 }
 0x1d5   : > { %v1390_v22 = vpop.eup %1389 }
 0x1d6   : > { %400 = vrot.lane.b32.xlu1 %v1390_v22, %s1581_s23 }
 0x248   : > { %v401_v25 = vpop.permute.xlu1 %400 }
 0x249   : > { %v1785_v26 = vmul.f32 %v401_v25, %v398_v24  ;;  %v291_v24 = vld [vmem:[#allocation6 + $0xa0] sm:$0xff]  ;;  %v297_v25 = vld [vmem:[#allocation6 + $0xd0] sm:$0xff] }
 0x24b   : > { %409 = vrot.lane.b32.xlu1 %v1785_v26, %s1581_s23 }
 0x2bd   : > { %v410_v27 = vpop.permute.xlu1 %409 }
 0x2be   : > { %1236 = vmatmul.mubr.msk.f32.vlgmr.msra.gmra.mxu1 %vm411_vm2, %v410_v27  ;;  %v1174_v27 = vld [vmem:[#allocation8 + $0x7] ss:$0 sm:$0xff] }
 0x2bf   : > { %1257 = vmatprep.mubr.msk.f32.mxu1 %vm1579_vm0, %v1578_v1  ;;  %1250 = vmatpush3.msra.mxu1 %v284_v46 }
 0x2c0   : > { %1251 = vmatprep.subr.mxu1 %v1578_v1 }
 0x2c1   : > { %1252 = vmatpush3.msra.mxu1 %v283_v51 }
 0x2c2   : > { %1253 = vmatprep.subr.mxu1 %v1578_v1 }
 0x2c3   : > { %1254 = vmatpush3.msra.mxu1 %v282_v52 }
 0x2c4   : > { %1255 = vmatprep.subr.mxu1 %v1578_v1 }
 0x2c5   : > { %1256 = vmatpush3.msra.mxu1 %v281_v53 }
 0x2c6   : > { %1271 = vmatprep.subr.mxu1 %v1578_v1 }
 0x37e   : > { %v480_v29 = vpop.f32.mrf.mxu1 }
 0x37f   : > { %v481_v30 = vadd.f32 %v1164_v28, %v480_v29  ;;  %v845_v29 = vstv %s1158_s30 }
 0x380   : > { %v1237_v31 = vpop.f32.mrf.mxu1 }
 0x381   : > { %v488_v32 = vadd.f32 %v1166_v23, %v481_v30  ;;  %v292_v23 = vld [vmem:[#allocation6 + $0xa8] sm:$0xff] }
 0x383   : > { %v1167_v33 = vmul.f32 -1.442695, %v488_v32 }
 0x385   : > { %1391 = vpow2.f32 %v1167_v33 }
 0x392   : > { %v1392_v34 = vpop.eup %1391 }
 0x393   : > { %v492_v35 = vadd.f32 1.0, %v1392_v34  ;;  %v296_v34 = vld [vmem:[#allocation6 + $0xc8] sm:$0xff] }
 0x395   : > { %1393 = vrcp.f32 %v492_v35  ;;  %v295_v35 = vld [vmem:[#allocation6 + $0xc0] sm:$0xff] }
 0x3a2   : > { %v1394_v37 = vpop.eup %1393 }
 0x3a3   : > { %v499_v38 = vmul.f32 %v1394_v37, %v497_v36  ;;  %v506_v47 = vsub.f32 1.0, %v1394_v37  ;;  %v294_v36 = vld [vmem:[#allocation6 + $0xb8] sm:$0xff]  ;;  %v1176_v37 = vld [vmem:[#allocation8 + $0x8] ss:$0 sm:$0xff] }
 0x3a5   : > { %501 = vrot.lane.b32.xlu1 %v499_v38, %s1580_s21  ;;  %s1841_s21 = scalar_lea.hbm %s1882_s4, %s1182_s29 }
 0x417   : > { %v502_v39 = vpop.permute.xlu1 %501 }
 0x418   : > { %v504_v40 = vadd.f32 %v502_v39, %v481_v30  ;;  %v926_v39 = vstv %s1159_s5 }
 0x41a   : > { %1395 = vtanh.f32 %v504_v40 }
 0x427   : > { %v1396_v45 = vpop.eup %1395 }
 0x428   : > { %508 = vrot.lane.b32.xlu0 %v1396_v45, %s1581_s23 }
 0x49a   : > { %v509_v48 = vpop.permute.xlu0 %508 }
 0x49b   : > { %v1799_v49 = vmul.f32 %v509_v48, %v506_v47 }
 0x49d   : > { %517 = vrot.lane.b32.xlu1 %v1799_v49, %s1581_s23  ;;  %s1029_s23 = scalar_lea.sflag [#allocation4], %s1745_s9 }
 0x50f   : > { %v518_v50 = vpop.permute.xlu1 %517 }
 0x510   : > { %1247 = vmatmul.mubr.msk.f32.vlgmr.msra.gmra.mxu0 %vm411_vm2, %v518_v50 }
 0x511   : > { %1268 = vmatprep.mubr.msk.f32.mxu0 %vm1579_vm0, %v1578_v1  ;;  %1261 = vmatpush3.msra.mxu0 %v288_v54 }
 0x512   : > { %1262 = vmatprep.subr.mxu0 %v1578_v1 }
 0x513   : > { %1263 = vmatpush3.msra.mxu0 %v287_v62 }
 0x514   : > { %1264 = vmatprep.subr.mxu0 %v1578_v1 }
 0x515   : > { %1265 = vmatpush3.msra.mxu0 %v286_v63 }
 0x516   : > { %1266 = vmatprep.subr.mxu0 %v1578_v1 }
 0x517   : > { %1267 = vmatpush3.msra.mxu0 %v285_v0 }
 0x518   : > { %1276 = vmatprep.subr.mxu0 %v1578_v1 }
 0x5d0   : > { %v587_v56 = vpop.f32.mrf.mxu0 }
 0x5d1   : > { %v588_v58 = vadd.f32 %v1168_v55, %v587_v56 }
 0x5d2   : > { %v1248_v59 = vpop.f32.mrf.mxu0 }
 0x5d3   : > { %vm591_vm3 = vcmp.ge.f32.partialorder %v588_v58, 0.0  ;;  %v593_v60 = vmul.f32 %v592_v57, %v588_v58 }
 0x5d5   : > { %v594_v61 = vsel %vm591_vm3, %v588_v58, %v593_v60 }
 0x5d6   : > { %1258 = vmatmul.mubr.msk.f32.vlgmr.msra.gmra.mxu1 %vm411_vm2, %v594_v61 }
 0x5d7   : > { %1273 = vmatprep.mubr.msk.f32.mxu1 %vm1579_vm0, %v1578_v1  ;;  %1272 = vmatpush3.msra.mxu1 %v289_v16 }
 0x5d8   : > { %1287 = vmatprep.subr.mxu1 %v1578_v1 }
 0x696   : > { %v668_v3 = vpop.f32.mrf.mxu1 }
 0x697   : > { %v669_v6 = vadd.f32 %v1170_v2, %v668_v3 }
 0x698   : > { %v1259_v7 = vpop.f32.mrf.mxu1 }
 0x699   : > { %vm672_vm4 = vcmp.ge.f32.partialorder %v669_v6, 0.0  ;;  %v674_v8 = vmul.f32 %v673_v5, %v669_v6 }
 0x69b   : > { %v675_v9 = vsel %vm672_vm4, %v669_v6, %v674_v8 }
 0x69c   : > { %1269 = vmatmul.mubr.msk.f32.vlgmr.msra.gmra.mxu0 %vm411_vm2, %v675_v9 }
 0x69d   : > { %1284 = vmatprep.mubr.msk.f32.mxu0 %vm1579_vm0, %v1578_v1  ;;  %1277 = vmatpush3.msra.mxu0 %v293_v18 }
 0x69e   : > { %1278 = vmatprep.subr.mxu0 %v1578_v1 }
 0x69f   : > { %1279 = vmatpush3.msra.mxu0 %v292_v23 }
 0x6a0   : > { %1280 = vmatprep.subr.mxu0 %v1578_v1 }
 0x6a1   : > { %1281 = vmatpush3.msra.mxu0 %v291_v24 }
 0x6a2   : > { %1282 = vmatprep.subr.mxu0 %v1578_v1 }
 0x75c   : > { %v749_v11 = vpop.f32.mrf.mxu0 }
 0x75d   : > { %v750_v12 = vadd.f32 %v1172_v10, %v749_v11 }
 0x75e   : > { %v1270_v13 = vpop.f32.mrf.mxu0 }
 0x75f   : > { %v753_v14 = vmul.f32 0.5, %v750_v12 }
 0x761   : > { %v754_v15 = vmul.f32 1.442695, %v753_v14 }
 0x763   : > { %1397 = vpow2.f32 %v754_v15 }
 0x770   : > { %v1398_v17 = vpop.eup %1397 }
 0x771   : > { %757 = vrot.lane.b32.xlu0 %v1398_v17, %s1582_s11 }
 0x775   : > { %1013 = vrot.lane.b32.xlu0 %v750_v12, %s1583_s12 }
 0x7e3   : > { %v758_v19 = vpop.permute.xlu0 %757 }
 0x7e4   : > { %v760_v20 = vmul.f32 %v758_v19, %v1766_v4  ;;  %v290_v4 = vld [vmem:[#allocation6 + $0x98] sm:$0xff] }
 0x7e5   : > { %1283 = vmatpush3.msra.mxu0 %v290_v4 }
 0x7e6   : > { %762 = vrot.lane.b32.xlu1 %v760_v20, %s1584_s25 }
 0x7e7   : > { %v1014_v51 = vpop.permute.xlu0 %1013 }
 0x7ea   : > { %1016 = vrot.lane.b32.xlu1 %v1799_v49, %s1585_s27 }
 0x858   : > { %v763_v21 = vpop.permute.xlu1 %762 }
 0x859   : > { %v765_v22 = vadd.f32 %v763_v21, %v750_v12 }
 0x85b   : > { %1274 = vmatmul.mubr.msk.f32.vlgmr.msra.gmra.mxu1 %vm770_vm5, %v765_v22 }
 0x85c   : > { %1295 = vmatprep.mubr.msk.f32.mxu1 %vm1579_vm0, %v1578_v1  ;;  %1288 = vmatpush3.msra.mxu1 %v297_v25  ;;  %v1017_v54 = vpop.permute.xlu1 %1016 }
 0x85d   : > { %1289 = vmatprep.subr.mxu1 %v1578_v1 }
 0x85e   : > { %1290 = vmatpush3.msra.mxu1 %v296_v34 }
 0x85f   : > { %1291 = vmatprep.subr.mxu1 %v1578_v1 }
 0x860   : > { %1292 = vmatpush3.msra.mxu1 %v295_v35 }
 0x861   : > { %1293 = vmatprep.subr.mxu1 %v1578_v1 }
 0x862   : > { %1294 = vmatpush3.msra.mxu1 %v294_v36 }
 0x91b   : > { %v840_v28 = vpop.f32.mrf.mxu1 }
 0x91c   : > { %v841_v30 = vadd.f32 %v1174_v27, %v840_v28 }
 0x91d   : > { %v1275_v31 = vpop.f32.mrf.mxu1 }
 0x91e   : > { %vm844_vm6 = vcmp.ge.f32.partialorder %v841_v30, 0.0  ;;  %v846_v32 = vmul.f32 %v845_v29, %v841_v30 }
 0x920   : > { %v847_v33 = vsel %vm844_vm6, %v841_v30, %v846_v32 }
 0x921   : > { %1285 = vmatmul.mubr.msk.f32.vlgmr.msra.gmra.mxu0 %vm411_vm2, %v847_v33 }
 0x9e1   : > { %v921_v38 = vpop.f32.mrf.mxu0 }
 0x9e2   : > { %v922_v40 = vadd.f32 %v1176_v37, %v921_v38 }
 0x9e3   : > { %v1286_v41 = vpop.f32.mrf.mxu0 }
 0x9e4   : > { %vm925_vm7 = vcmp.ge.f32.partialorder %v922_v40, 0.0  ;;  %v927_v42 = vmul.f32 %v926_v39, %v922_v40 }
 0x9e6   : > { %v928_v43 = vsel %vm925_vm7, %v922_v40, %v927_v42 }
 0x9e7   : > { %1296 = vmatmul.mubr.msk.f32.vlgmr.msra.gmra.mxu1 %vm411_vm2, %v928_v43 }
 0xaa7   : > { %v1002_v45 = vpop.f32.mrf.mxu1 }
 0xaa8   : > { %v1003_v46 = vadd.f32 %v1178_v44, %v1002_v45 }
 0xaa9   : > { %v1297_v47 = vpop.f32.mrf.mxu1 }
 0xaaa   : > { %v1180_v1 = vmul.f32 -1.442695, %v1003_v46 }
 0xaac   : > { %1399 = vpow2.f32 %v1180_v1 }
 0xab9   : > { %v1400_v48 = vpop.eup %1399 }
 0xaba   : > { %v1009_v49 = vadd.f32 1.0, %v1400_v48 }
 0xabc   : > { %1401 = vrcp.f32 %v1009_v49 }
 0xac9   : > { %v1402_v50 = vpop.eup %1401 }
 0xaca   : > { %v1019_v52 = vsel %vm302_vm1, %v1402_v50, %v1014_v51 }
 0xacb   : > { %v1021_v53 = vsel %vm1020_vm8, %v1019_v52, %v1014_v51 }
 0xacc   : > { %v1022_v55 = vsel %vm411_vm2, %v1021_v53, %v1785_v26 }
 0xacd   : > { %v1024_v56 = vsel %vm1023_vm9, %v1022_v55, %v1017_v54 }
 0xace   : > { %v1026_v57 = vsel %vm1025_vm10, %v1024_v56, 0.0 }
 0xacf   : > { %1027 = vst [vmem:[%s255_s6] sm:$0xff] %v1026_v57 }
 0xad0   : > { %1511 = shalt.err (!%p1508_p9)
}
 0xad1   : > { %s1512_s11 = scalar_lea.hbm %s1841_s21, 128  ;;  %s1516_s25 = scalar_lea.hbm %s1882_s4, 256 }
 0xad2   : > { %p1513_p13 = scmp.ne.s32.totalorder %s1841_s21, %s1512_s11  ;;  %p1517_p7 = scmp.lt.s32.totalorder %s1841_s21, %s1882_s4 }
 0xad3   : > { %p1518_p11 = scmp.lt.s32.totalorder %s1516_s25, %s1512_s11 }
 0xad4   : > { %p1514_p4 = pnand %p1513_p13, %p1900_p0 }
 0xad5   : > { %p1519_p6 = por %p1518_p11, %p1517_p7 }
 0xad6   : > { %p1515_p8 = pneg %p1514_p4 }
 0xad8   : > { %p1520_p12 = pnand %p1519_p6, %p1515_p8 }
 0xada   : > { %1523 = shalt.err (!%p1520_p12)
}
 0xadb   : > { %1312 = dma.vmem_to_hbm [thread:$0]  (%p1900_p0), %s1043_s7, 128, %s1841_s21, %s1029_s23  }
 0xadc PF: > { %s1054_s5 = sand.u32 1, %s1558_s15   ;;  %p1901_p5 = scmp.ne.s32.totalorder %s1888_s22, 0 }
 0xadd   : > { %p1902_p3 = scmp.ge.s32.totalorder %s1570_s18, 2  ;;  %s1055_s29 = scalar_lea.sflag [#allocation4], %s1054_s5 }
 0xadf   : > { %p1329_p10 = pnand %p1902_p3, %p1901_p5 }
 0xae1   : > { %p1330_p1 = pneg %p1329_p10 }
 0xae3   : > { %1553 = dma.done.wait (%p1330_p1), %s1055_s29, 128  }
 0xae4   : > { %1555 = vsyncadd (%p1330_p1), %s1055_s29, 4294967168  ;;  %p19_p2 = scmp.ge.s32.totalorder %s1699_s24, 4   ;;  %s1903_s15 = smov %s1562_s16 }
 0xae5   : > { %s1904_s16 = smov %s1566_s17  ;;  %s1905_s17 = smov %s1709_s26 }
 0xae6   : > { %s1906_s18 = smov %s1699_s24  ;;  %21 = sbr.rel (!%p19_p2) target bundleno = 7 (0x7), region = 94 }
 0xaeb   :  { %1060 = vsyncpa [#allocation3], 1 }
 0xaec   :  { %1062 = vsyncpa [#allocation3 + $0x1], 1 }
 0xaed   :  { %1063 = vsyncpa [#allocation7], 1 }
 0xaee   :  { %1064 = vsyncpa [#allocation4], 1 }
 0xaef   :  { %1066 = vsyncpa [#allocation4 + $0x1], 1 }
 0xaf0   :  { %1067 = vsyncpa [#allocation5], 1 }
 0xaf1   :  { %1069 = vsyncpa [#allocation5 + $0x1], 1 }

</bundles_post_ra>
